<compile_context>
chip_gen: v6e
topology: v6e:2x2x1
jax: 0.10.0
libtpu: 0.0.40
codegen_flags: <defaults>
</compile_context>

<pallas_src>
import functools

import jax
import jax.numpy as jnp
from jax import lax
from jax.experimental import pallas as pl
from jax.experimental.pallas import tpu as pltpu


def _round_up(x, m):
    return ((x + m - 1) // m) * m


def _fused_gather_kernel(idx_ref, tab_ref, out_ref):
    """One grid step: gather bn quads with a single one-hot MXU matmul.

    idx_ref: (bn, 4) int32  -- [head, relation, tail, timestamp] indices,
             already offset into the combined table's row space.
    tab_ref: (E_total, 4*D) -- block-diagonal combined embedding table.
    out_ref: (bn, 4*D)      -- lane-dense fused output block.
    """
    idx = idx_ref[...]                                  # (bn, 4) int32
    bn = out_ref.shape[0]
    e_total = tab_ref.shape[0]
    iota = lax.broadcasted_iota(jnp.int32, (bn, e_total), 1)
    # The four offset ranges are disjoint, so OR-ing the four per-slot one-hots
    # gives a row with exactly four ones (one per output D-slot).
    one_hot = ((idx[:, 0:1] == iota) | (idx[:, 1:2] == iota) |
               (idx[:, 2:3] == iota) | (idx[:, 3:4] == iota))
    out_ref[...] = jnp.dot(
        one_hot.astype(tab_ref.dtype), tab_ref[...],
        preferred_element_type=jnp.float32).astype(out_ref.dtype)


def _build_combined_table(entity_table, relation_table, timestamp_table):
    """Pack the three tables block-diagonally into one (E_total, 4*D) table."""
    e_ent, d = entity_table.shape
    e_rel = relation_table.shape[0]
    e_ts = timestamp_table.shape[0]
    ep, rp, tp = _round_up(e_ent, 8), _round_up(e_rel, 8), _round_up(e_ts, 8)
    off_h, off_r, off_t, off_s = 0, ep, ep + rp, ep + rp + ep
    e_total = ep + rp + ep + tp                       # multiple of 8
    tab = jnp.zeros((e_total, 4 * d), entity_table.dtype)
    tab = tab.at[off_h:off_h + e_ent, 0 * d:1 * d].set(entity_table)   # head
    tab = tab.at[off_r:off_r + e_rel, 1 * d:2 * d].set(relation_table) # relation
    tab = tab.at[off_t:off_t + e_ent, 2 * d:3 * d].set(entity_table)   # tail
    tab = tab.at[off_s:off_s + e_ts, 3 * d:4 * d].set(timestamp_table) # timestamp
    return tab, (off_h, off_r, off_t, off_s)


@functools.partial(jax.jit, static_argnames=("block_n",))
def fused_tkg_lookup(entity_table, relation_table, timestamp_table,
                     head, relation, tail, timestamp, *, block_n=512):
    """Fused Pallas gather: (ent[head], rel[relation], ent[tail], ts[timestamp])."""
    assert head.ndim == relation.ndim == tail.ndim == timestamp.ndim == 1
    n = head.shape[0]
    e_ent, d = entity_table.shape
    e_rel, d_r = relation_table.shape
    e_ts, d_t = timestamp_table.shape
    assert d_r == d and d_t == d

    # Batch tiling: big tiles to amortize per-step pipeline overhead, but keep
    # >= 2 grid steps when possible so the parallel axis covers both v7x cores.
    bn = max(8, min(block_n, _round_up(n, 8)))
    if _round_up(n, bn) // bn < 2 and bn > 8:
        bn = max(8, _round_up((n + 1) // 2, 8))
    n_pad = _round_up(n, bn)

    tab, (off_h, off_r, off_t, off_s) = _build_combined_table(
        entity_table, relation_table, timestamp_table)
    e_total = tab.shape[0]

    # Clamp in-range (OOB-safe; differs from PyTorch which raises), add the
    # combined-table row offsets, pack as (n_pad, 4) int32.
    h_p = jnp.clip(head.astype(jnp.int32), 0, e_ent - 1) + off_h
    r_p = jnp.clip(relation.astype(jnp.int32), 0, e_rel - 1) + off_r
    t_p = jnp.clip(tail.astype(jnp.int32), 0, e_ent - 1) + off_t
    s_p = jnp.clip(timestamp.astype(jnp.int32), 0, e_ts - 1) + off_s
    idx = jnp.stack([h_p, r_p, t_p, s_p], axis=1)           # (n, 4)
    idx = jnp.pad(idx, ((0, n_pad - n), (0, 0)))             # (n_pad, 4)

    # Explicit VMEM budget: table (x2 buffers), index block (x2), output block
    # (x2), one-hot intermediate, plus headroom.
    itemsize = jnp.dtype(entity_table.dtype).itemsize
    tab_bytes = e_total * 4 * d * itemsize
    out_blk_bytes = bn * 4 * d * itemsize
    idx_blk_bytes = bn * 128 * 4                              # lane-padded int32
    onehot_bytes = bn * _round_up(e_total, 128) * 4
    est = 2 * (tab_bytes + out_blk_bytes + idx_blk_bytes) + 2 * onehot_bytes \
        + (2 << 20)
    vmem_limit = int(min(max(est, 8 << 20), 64 << 20))

    out = pl.pallas_call(
        _fused_gather_kernel,
        out_shape=jax.ShapeDtypeStruct((n_pad, 4 * d), entity_table.dtype),
        grid_spec=pltpu.PrefetchScalarGridSpec(
            num_scalar_prefetch=0,
            grid=(n_pad // bn,),
            in_specs=[
                pl.BlockSpec((bn, 4), lambda i: (i, 0)),            # indices
                pl.BlockSpec((e_total, 4 * d), lambda i: (0, 0)),   # full table
            ],
            out_specs=pl.BlockSpec((bn, 4 * d), lambda i: (i, 0)),
        ),
        compiler_params=pltpu.CompilerParams(
            dimension_semantics=("parallel",),
            vmem_limit_bytes=vmem_limit),
    )(idx, tab)

    out = out[:n]
    return (out[:, 0 * d:1 * d], out[:, 1 * d:2 * d],
            out[:, 2 * d:3 * d], out[:, 3 * d:4 * d])


class PretrainedTKGEmbeddingWithTimestamps:
    """JAX/Pallas port of the PyTorch module (forward pass only).

    TODO(synk): the `pretrain` training loop (Adam/DataLoader/early stopping)
    is host-side training logic with no Pallas equivalent; only forward is
    implemented here.
    """

    def __init__(self, num_entities, num_relations, embedding_dim,
                 num_timestamps, key):
        k_e, k_r, k_t = jax.random.split(key, 3)
        # nn.Embedding default init: N(0, 1)
        self.entity_embedding = jax.random.normal(
            k_e, (num_entities, embedding_dim), dtype=jnp.float32)
        self.relation_embedding = jax.random.normal(
            k_r, (num_relations, embedding_dim), dtype=jnp.float32)
        self.timestamp_embedding = jax.random.normal(
            k_t, (num_timestamps, embedding_dim), dtype=jnp.float32)

    def forward(self, head, relation, tail, timestamp):
        return fused_tkg_lookup(
            self.entity_embedding, self.relation_embedding,
            self.timestamp_embedding, head, relation, tail, timestamp)

    __call__ = forward


if __name__ == "__main__":
    key = jax.random.PRNGKey(0)
    k_params, k_h, k_r, k_t, k_ts = jax.random.split(key, 5)

    num_entities = 10       # number of variables
    num_relations = 4       # e.g. lags
    num_timestamps = 12     # discrete time bins
    embedding_dim = 32
    batch = 16

    module = PretrainedTKGEmbeddingWithTimestamps(
        num_entities, num_relations, embedding_dim, num_timestamps, k_params)

    head = jax.random.randint(k_h, (batch,), 0, num_entities, dtype=jnp.int32)
    relation = jax.random.randint(k_r, (batch,), 0, num_relations, dtype=jnp.int32)
    tail = jax.random.randint(k_t, (batch,), 0, num_entities, dtype=jnp.int32)
    timestamp = jax.random.randint(k_ts, (batch,), 0, num_timestamps, dtype=jnp.int32)

    head_emb, relation_emb, tail_emb, timestamp_emb = jax.block_until_ready(
        module(head, relation, tail, timestamp))

    # Reference check against plain-JAX gathers.
    assert jnp.allclose(head_emb, module.entity_embedding[head])
    assert jnp.allclose(relation_emb, module.relation_embedding[relation])
    assert jnp.allclose(tail_emb, module.entity_embedding[tail])
    assert jnp.allclose(timestamp_emb, module.timestamp_embedding[timestamp])
    assert head_emb.shape == (batch, embedding_dim)
    assert relation_emb.shape == (batch, embedding_dim)
    assert tail_emb.shape == (batch, embedding_dim)
    assert timestamp_emb.shape == (batch, embedding_dim)

    print("KERNEL_OK")
</pallas_src>

<mosaic_0001>
module attributes {stable_mosaic.version = 11 : i64} {
  func.func @_fused_gather_kernel(%arg0: i32, %arg1: memref<8x4xi32, #tpu.memory_space<vmem>>, %arg2: memref<56x128xf32, #tpu.memory_space<vmem>>, %arg3: memref<8x128xf32, #tpu.memory_space<vmem>>) attributes {dimension_semantics = [#tpu.dimension_semantics<parallel>], iteration_bounds = array<i64: 2>, scalar_prefetch = 0 : i64, scratch_operands = 0 : i64, tpu.core_type = #tpu.core_type<tc>, window_params = [{transform_indices = @transform_0, window_bounds = array<i64: 8, 4>}, {pipeline_mode = #tpu.pipeline_mode<synchronous>, transform_indices = @transform_1, window_bounds = array<i64: 56, 128>}, {transform_indices = @transform_2, window_bounds = array<i64: 8, 128>}]} {
    %c0 = arith.constant 0 : index
    %c0_0 = arith.constant 0 : index
    %0 = vector.load %arg1[%c0, %c0_0] : memref<8x4xi32, #tpu.memory_space<vmem>>, vector<8x4xi32>
    %1 = tpu.iota {dimensions = array<i32: 1>} : vector<8x56xi32>
    %2 = vector.extract_strided_slice %0 {offsets = [0, 0], sizes = [8, 1], strides = [1, 1]} : vector<8x4xi32> to vector<8x1xi32>
    %3 = vector.broadcast %2 : vector<8x1xi32> to vector<8x56xi32>
    %4 = arith.cmpi eq, %3, %1 : vector<8x56xi32>
    %5 = vector.extract_strided_slice %0 {offsets = [0, 1], sizes = [8, 1], strides = [1, 1]} : vector<8x4xi32> to vector<8x1xi32>
    %6 = vector.broadcast %5 : vector<8x1xi32> to vector<8x56xi32>
    %7 = arith.cmpi eq, %6, %1 : vector<8x56xi32>
    %8 = arith.ori %4, %7 : vector<8x56xi1>
    %9 = vector.extract_strided_slice %0 {offsets = [0, 2], sizes = [8, 1], strides = [1, 1]} : vector<8x4xi32> to vector<8x1xi32>
    %10 = vector.broadcast %9 : vector<8x1xi32> to vector<8x56xi32>
    %11 = arith.cmpi eq, %10, %1 : vector<8x56xi32>
    %12 = arith.ori %8, %11 : vector<8x56xi1>
    %13 = vector.extract_strided_slice %0 {offsets = [0, 3], sizes = [8, 1], strides = [1, 1]} : vector<8x4xi32> to vector<8x1xi32>
    %14 = vector.broadcast %13 : vector<8x1xi32> to vector<8x56xi32>
    %15 = arith.cmpi eq, %14, %1 : vector<8x56xi32>
    %16 = arith.ori %12, %15 : vector<8x56xi1>
    %17 = arith.extui %16 : vector<8x56xi1> to vector<8x56xi32>
    %18 = arith.sitofp %17 : vector<8x56xi32> to vector<8x56xf32>
    %c0_1 = arith.constant 0 : index
    %c0_2 = arith.constant 0 : index
    %19 = vector.load %arg2[%c0_1, %c0_2] : memref<56x128xf32, #tpu.memory_space<vmem>>, vector<56x128xf32>
    %cst = arith.constant dense<0.000000e+00> : vector<8x128xf32>
    %20 = tpu.matmul %18, %19, %cst {dimension_numbers = #tpu.dot_dimension_numbers<[1], [0], [0], [1], [0, 0, 1, 1], [], []>} : vector<8x56xf32>, vector<56x128xf32>, vector<8x128xf32> -> vector<8x128xf32>
    %c0_3 = arith.constant 0 : index
    %c0_4 = arith.constant 0 : index
    %21 = vector.load %arg3[%c0_3, %c0_4] : memref<8x128xf32, #tpu.memory_space<vmem>>, vector<8x128xf32>
    tpu.vector_store %arg3[%c0_3, %c0_4], %20 {strides = array<i32>} : memref<8x128xf32, #tpu.memory_space<vmem>>, vector<8x128xf32>,
    return
  }
  func.func @transform_0(%arg0: i32) -> (i32, i32) {
    %c0_i32 = arith.constant 0 : i32
    %c0_i32_0 = arith.constant 0 : i32
    return %arg0, %c0_i32 : i32, i32
  }
  func.func @transform_1(%arg0: i32) -> (i32, i32) {
    %c0_i32 = arith.constant 0 : i32
    %c0_i32_0 = arith.constant 0 : i32
    %c0_i32_1 = arith.constant 0 : i32
    return %c0_i32, %c0_i32_0 : i32, i32
  }
  func.func @transform_2(%arg0: i32) -> (i32, i32) {
    %c0_i32 = arith.constant 0 : i32
    %c0_i32_0 = arith.constant 0 : i32
    return %arg0, %c0_i32 : i32, i32
  }
}

</mosaic_0001>

<bundles_post_ra>
// kernel: fused_tkg_lookup.1
= control target key start
LH: loop header
LB: loop body
LE: loop exit
PB: predicated region body
PF: predicated region fallthrough
CT: control target
= control target key end

     0   :  { %s382_s9 = smov 0   ;;  %s427_s0 = inlined_call_operand.vmem [shape: s32[16,4], index: 0, kind: input, shape index: {}]   ;;  %s428_s1 = inlined_call_operand.vmem [shape: f32[56,128], index: 1, kind: input, shape index: {}]   ;;  %s429_s2 = inlined_call_operand.vmem [shape: f32[16,128], index: 2, kind: output, shape index: {}]  }
   0x1 LB: > { %s298_s10 = sadd.s32 4294967295, %s359_s9   ;;  %p302_p0 = scmp.ge.s32.totalorder %s359_s9, 1  ;;  %s359_s9 = sphi %s382_s9, %s12_s9  }
   0x2   : > { %p111_p1 = scmp.lt.s32.totalorder %s359_s9, 3 }
   0x4   : > { %p112_p2 = pnand %p302_p0, %p111_p1 }
   0x5   : > { %p131_p3 = scmp.lt.s32.totalorder (!%p112_p2), %s298_s10, 1 }
   0x6   : > { %115 = sbr.rel (%p112_p2) target bundleno = 345 (0x159), region = 28 }
   0xb   : > { %v169_v0 = vld [vmem:[%s428_s1 + $0x30] sm:$0xff]  ;;  %v361_v1 = vmov 0   ;;  %v362_v2 = vmov 2   ;;  %s431_s10 = smov (!%p131_p3, %s298_s10), 1  ;;  %v363_v3 = vmov 0.0   ;;  %v168_v4 = vld [vmem:[%s428_s1 + $0x28] sm:$0xff]  ;;  %v140_v13 = vlaneseq }
   0xc   : > { %348 = vset.pattern.permute.xlu0 %v361_v1  ;;  %350 = vset.pattern.permute.xlu1 %v362_v2  ;;  %s303_s15 = sshll.u32 %s431_s10, 3  ;;  %v167_v5 = vld [vmem:[%s428_s1 + $0x20] sm:$0xff]  ;;  %v166_v7 = vld [vmem:[%s428_s1 + $0x18] sm:$0xff]  ;;  %v364_v8 = vmov 1   ;;  %v365_v9 = vmov 3   ;;  %v165_v10 = vld [vmem:[%s428_s1 + $0x10] sm:$0xff] }
   0xd   : > { %317 = vmatprep.subr.mxu0 %v363_v3  ;;  %s134_s18 = scalar_lea.vmem %s427_s0, %s303_s15  ;;  %v164_v11 = vld [vmem:[%s428_s1 + $0x8] sm:$0xff]  ;;  %vm366_vm0 = vmmov 0   ;;  %v163_v12 = vld [vmem:[%s428_s1] sm:$0xff]  ;;  %v141_v16 = vand.u32 127, %v140_v13  ;;  %vm170_vm7 = vcmask 457728   ;;  %s138_s3 = scalar_lea.vmem %s429_s2, %s303_s15 }
   0xe   : > { %318 = vmatpush3.msra.mxu0 %v169_v0  ;;  %v139_v6 = vld [vmem:[%s134_s18] sm:$0xff]  ;;  %331 = vmatprep.mubr.msk.f32.mxu0 %vm366_vm0, %v363_v3 }
   0xf   : > { %319 = vmatprep.subr.mxu0 %v363_v3  ;;  %143 = vperm.xlu0 %348, %v139_v6  }
  0x10   : > { %320 = vmatpush3.msra.mxu0 %v168_v4  ;;  %152 = vperm.xlu1 %350, %v139_v6  }
  0x11   : > { %321 = vmatprep.subr.mxu0 %v363_v3 }
  0x12   : > { %322 = vmatpush3.msra.mxu0 %v167_v5 }
  0x13   : > { %323 = vmatprep.subr.mxu0 %v363_v3  ;;  %349 = vset.pattern.permute.xlu0 %v364_v8 }
  0x14   : > { %324 = vmatpush3.msra.mxu0 %v166_v7  ;;  %351 = vset.pattern.permute.xlu1 %v365_v9 }
  0x15   : > { %147 = vperm.xlu0 %349, %v139_v6   ;;  %157 = vperm.xlu1 %351, %v139_v6  }
  0x16   : > { %325 = vmatprep.subr.mxu0 %v363_v3 }
  0x17   : > { %326 = vmatpush3.msra.mxu0 %v165_v10 }
  0x18   : > { %327 = vmatprep.subr.mxu0 %v363_v3 }
  0x19   : > { %328 = vmatpush3.msra.mxu0 %v164_v11  ;;  %352 = vset.pattern.permute.xlu0 %v365_v9 }
  0x1a   : > { %329 = vmatprep.subr.mxu0 %v363_v3 }
  0x1b   : > { %330 = vmatpush3.msra.mxu0 %v163_v12 }
  0x8a   : > { %v144_v14 = vpop.permute.xlu0 %143 }
  0x8b   : > { %v153_v15 = vpop.permute.xlu1 %152  ;;  %vm145_vm1 = vcmp.eq.s32.totalorder %v144_v14, %v141_v16 }
  0x8c   : > { %vm154_vm4 = vcmp.eq.s32.totalorder %v153_v15, %v141_v16 }
  0x90   : > { %v148_v17 = vpop.permute.xlu0 %147  ;;  %v158_v18 = vpop.permute.xlu1 %157 }
  0x91   : > { %vm149_vm2 = vcmp.eq.s32.totalorder %v148_v17, %v141_v16  ;;  %vm159_vm3 = vcmp.eq.s32.totalorder %v158_v18, %v141_v16 }
  0x92   : > { %vm150_vm5 = vmor %vm145_vm1, %vm149_vm2 }
  0x93   : > { %vm155_vm6 = vmor %vm150_vm5, %vm154_vm4 }
  0x94   : > { %vm160_vm8 = vmor %vm155_vm6, %vm159_vm3 }
  0x95   : > { %v305_v19 = vsel %vm160_vm8, 1.0, %v363_v3 }
  0x96   : > { %332 = vmatmul.mubr.msk.f32.vlgmr.msra.gmra.mxu0 %vm170_vm7, %v305_v19 }
 0x156   : > { %v240_v20 = vpop.f32.mrf.mxu0 }
 0x157   : > { %244 = vst [vmem:[%s138_s3] sm:$0xff] %v240_v20 }
 0x158   : > { %v333_v21 = vpop.f32.mrf.mxu0 }
 0x159 PF: > { %s12_s9 = sadd.s32 1, %s359_s9  }
 0x15a   : > { %p9_p4 = scmp.ge.s32.totalorder %s12_s9, 4  }
 0x15c   :  { %11 = sbr.rel (!%p9_p4) target bundleno = 1 (0x1), region = 58 }

</bundles_post_ra>
